<compile_context>
chip_gen: v6e
topology: v6e:2x2x1
jax: 0.10.0
libtpu: 0.0.40
codegen_flags: <defaults>
</compile_context>

<pallas_src>
import functools
from typing import NamedTuple

import jax
import jax.numpy as jnp
from jax import lax
from jax.experimental import pallas as pl
from jax.experimental.pallas import tpu as pltpu


def _round_up(x, m):
    return ((x + m - 1) // m) * m


def _tpu_defaults():
    """Per-generation (lane alignment, VMEM budget) defaults."""
    try:
        kind = jax.devices()[0].device_kind.lower()
    except Exception:
        kind = ""
    if "v7" in kind:   # 64 MiB VMEM / TC, 2x256x256 MXU
        return 256, 48 * 1024 * 1024
    if "v6" in kind:   # 128 MiB VMEM, 2x256x256 MXU
        return 256, 100 * 1024 * 1024
    if "v5" in kind:   # 128 MiB VMEM, 4x128x128 MXU -> 128-alignment is enough
        return 128, 100 * 1024 * 1024
    return 128, 64 * 1024 * 1024


class FFNParams(NamedTuple):
    """FFN weights, padded / cast / chunked once outside the hot path."""
    w1c: jax.Array   # (n_chunks, d_model_p, t_ff)   compute dtype
    b1c: jax.Array   # (n_chunks, 1, t_ff)           float32
    w2c: jax.Array   # (n_chunks, t_ff, d_model_p)   compute dtype
    b2p: jax.Array   # (1, d_model_p)                float32
    d_model: int
    d_ff: int
    d_model_p: int
    d_ff_p: int
    t_ff: int
    n_ff_chunks: int


def prepare_ffn_params(w1, b1, w2, b2, *, t_ff=1024, lane_align=None,
                       compute_dtype=jnp.bfloat16):
    """Pad, cast and d_ff-chunk the FFN weights (call once, reuse every step).

    w1: (d_model, d_ff)  == torch linear1.weight.T     b1: (d_ff,)
    w2: (d_ff, d_model)  == torch linear2.weight.T     b2: (d_model,)
    """
    if lane_align is None:
        lane_align, _ = _tpu_defaults()
    d_model, d_ff = w1.shape
    d_model_p = _round_up(d_model, lane_align)
    d_ff_p = _round_up(d_ff, lane_align)

    # Largest lane-aligned t_ff that divides d_ff_p exactly (no wasted chunk).
    t_ff = min(_round_up(t_ff, lane_align), d_ff_p)
    while d_ff_p % t_ff:
        t_ff -= lane_align
    n_chunks = d_ff_p // t_ff

    w1p = jnp.pad(w1, ((0, d_model_p - d_model), (0, d_ff_p - d_ff))).astype(compute_dtype)
    w2p = jnp.pad(w2, ((0, d_ff_p - d_ff), (0, d_model_p - d_model))).astype(compute_dtype)
    b1p = jnp.pad(b1, (0, d_ff_p - d_ff)).astype(jnp.float32)
    b2p = jnp.pad(b2, (0, d_model_p - d_model)).astype(jnp.float32).reshape(1, d_model_p)

    # Chunk d_ff into a leading axis: in-kernel access is a leading-axis index
    # (always tile-aligned), and the same layout serves both resident and
    # streamed execution via BlockSpec.
    w1c = w1p.reshape(d_model_p, n_chunks, t_ff).transpose(1, 0, 2)
    b1c = b1p.reshape(n_chunks, 1, t_ff)
    w2c = w2p.reshape(n_chunks, t_ff, d_model_p)

    return FFNParams(w1c, b1c, w2c, b2p, d_model, d_ff, d_model_p, d_ff_p,
                     t_ff, n_chunks)


# ----------------------------------------------------------------------------
# Kernels
# ----------------------------------------------------------------------------

def _ffn_resident_kernel(x_ref, w1_ref, b1_ref, w2_ref, b2_ref, o_ref, acc_ref,
                         *, n_ff_chunks, unroll):
    # x_ref:  (tm, d_model_p)              compute dtype
    # w1_ref: (n_chunks, d_model_p, t_ff)  compute dtype, resident (Buffered(1))
    # b1_ref: (n_chunks, 1, t_ff)          f32
    # w2_ref: (n_chunks, t_ff, d_model_p)  compute dtype, resident (Buffered(1))
    # b2_ref: (1, d_model_p)               f32
    # acc_ref:(tm, d_model_p)              f32 VMEM scratch

    # Fold b2 into the accumulator init (no extra VALU pass later).
    acc_ref[...] = jnp.broadcast_to(b2_ref[...], acc_ref.shape)
    x = x_ref[...]  # hoisted load of the row tile

    def body(k, carry):
        # Leading-axis chunk index: statically shaped, tile-aligned access.
        h = jnp.dot(x, w1_ref[k], preferred_element_type=jnp.float32)
        h = jnp.maximum(h + b1_ref[k], 0.0)            # bias + ReLU in f32
        acc_ref[...] += jnp.dot(h.astype(w2_ref.dtype), w2_ref[k],
                                preferred_element_type=jnp.float32)
        return carry

    # Small d_ff: fully unroll (static indices). Large d_ff: fixed partial
    # unroll so the LLO scheduler can overlap MXU pushes with the acc RMW.
    lax.fori_loop(0, n_ff_chunks, body, 0, unroll=unroll)

    o_ref[...] = acc_ref[...].astype(o_ref.dtype)


def _ffn_streamed_kernel(x_ref, w1_ref, b1_ref, w2_ref, b2_ref, o_ref, acc_ref):
    # Grid: (M tiles ["parallel"], d_ff chunks ["arbitrary"]).
    # w1_ref: (d_model_p, t_ff), b1_ref: (1, t_ff), w2_ref: (t_ff, d_model_p)
    # are streamed per d_ff chunk by the BlockSpec pipeline.
    k = pl.program_id(1)

    @pl.when(k == 0)
    def _():
        acc_ref[...] = jnp.broadcast_to(b2_ref[...], acc_ref.shape)

    h = jnp.dot(x_ref[...], w1_ref[...], preferred_element_type=jnp.float32)
    h = jnp.maximum(h + b1_ref[...], 0.0)
    acc_ref[...] += jnp.dot(h.astype(w2_ref.dtype), w2_ref[...],
                            preferred_element_type=jnp.float32)

    @pl.when(k == pl.num_programs(1) - 1)
    def _():
        o_ref[...] = acc_ref[...].astype(o_ref.dtype)


# ----------------------------------------------------------------------------
# Wrappers
# ----------------------------------------------------------------------------

def _weight_spec(shape, index_map, single_buffered):
    # Constant-index resident operands: single-buffer them (halves VMEM).
    if single_buffered:
        return pl.BlockSpec(shape, index_map, pipeline_mode=pl.Buffered(1))
    return pl.BlockSpec(shape, index_map)


def ffn_apply(x, params: FFNParams, *, tm=512, out_dtype=None,
              stream_weights=None, vmem_limit_bytes=None):
    """Fused linear2(relu(linear1(x))) with pre-prepared params.

    x: (batch, seq, d_model).  Returns (batch, seq, d_model) in out_dtype
    (defaults to x.dtype).
    """
    batch, seq, d_model = x.shape
    assert d_model == params.d_model
    if out_dtype is None:
        out_dtype = x.dtype
    if vmem_limit_bytes is None:
        _, vmem_limit_bytes = _tpu_defaults()

    compute_dtype = params.w1c.dtype
    d_model_p = params.d_model_p
    t_ff = params.t_ff
    n_chunks = params.n_ff_chunks
    M = batch * seq

    # Row tile: as large as requested, never larger than the (aligned) row count.
    row_align = 16 if jnp.dtype(compute_dtype).itemsize < 4 else 8
    tm = max(row_align, min(tm, _round_up(M, row_align)))
    tm = _round_up(tm, row_align)
    M_p = _round_up(M, tm)                 # pad rows instead of asserting

    x2d = jnp.pad(x.reshape(M, d_model),
                  ((0, M_p - M), (0, d_model_p - d_model))).astype(compute_dtype)

    # Resident vs. streamed: resident amortizes weight HBM reads across all M
    # tiles (preferred on 128 MiB parts); streaming is needed when W1+W2 plus
    # activations exceed the per-core VMEM budget (e.g. big FFNs on v7x).
    if stream_weights is None:
        itemsize = jnp.dtype(compute_dtype).itemsize
        w_bytes = ((params.w1c.size + params.w2c.size) * itemsize
                   + (params.b1c.size + params.b2p.size) * 4)
        act_bytes = (tm * d_model_p * (2 * itemsize + 2 * jnp.dtype(out_dtype).itemsize + 4)
                     + tm * t_ff * 4)
        stream_weights = (w_bytes + act_bytes) > int(0.85 * vmem_limit_bytes)

    def run(single_buffered_weights):
        if not stream_weights:
            unroll = n_chunks if n_chunks <= 8 else 4
            kernel = functools.partial(_ffn_resident_kernel,
                                       n_ff_chunks=n_chunks, unroll=unroll)
            grid = (M_p // tm,)
            in_specs = [
                pl.BlockSpec((tm, d_model_p), lambda i: (i, 0)),
                _weight_spec(params.w1c.shape, lambda i: (0, 0, 0), single_buffered_weights),
                _weight_spec(params.b1c.shape, lambda i: (0, 0, 0), single_buffered_weights),
                _weight_spec(params.w2c.shape, lambda i: (0, 0, 0), single_buffered_weights),
                _weight_spec(params.b2p.shape, lambda i: (0, 0), single_buffered_weights),
            ]
            out_specs = pl.BlockSpec((tm, d_model_p), lambda i: (i, 0))
            dim_sem = ("parallel",)
        else:
            kernel = _ffn_streamed_kernel
            grid = (M_p // tm, n_chunks)   # reduction (d_ff) axis last
            in_specs = [
                pl.BlockSpec((tm, d_model_p), lambda i, k: (i, 0)),
                pl.BlockSpec((None, d_model_p, t_ff), lambda i, k: (k, 0, 0)),
                pl.BlockSpec((None, 1, t_ff), lambda i, k: (k, 0, 0)),
                pl.BlockSpec((None, t_ff, d_model_p), lambda i, k: (k, 0, 0)),
                _weight_spec(params.b2p.shape, lambda i, k: (0, 0), single_buffered_weights),
            ]
            out_specs = pl.BlockSpec((tm, d_model_p), lambda i, k: (i, 0))
            dim_sem = ("parallel", "arbitrary")

        return pl.pallas_call(
            kernel,
            out_shape=jax.ShapeDtypeStruct((M_p, d_model_p), out_dtype),
            grid_spec=pltpu.PrefetchScalarGridSpec(
                num_scalar_prefetch=0,
                grid=grid,
                in_specs=in_specs,
                out_specs=out_specs,
                scratch_shapes=[pltpu.VMEM((tm, d_model_p), jnp.float32)],
            ),
            compiler_params=pltpu.CompilerParams(
                dimension_semantics=dim_sem,
                vmem_limit_bytes=vmem_limit_bytes,
            ),
        )(x2d, params.w1c, params.b1c, params.w2c, params.b2p)

    try:
        out2d = run(single_buffered_weights=True)
    except Exception:
        # Fallback if pipeline_mode=pl.Buffered(1) is unsupported by this jax.
        out2d = run(single_buffered_weights=False)

    return out2d[:M, :d_model].reshape(batch, seq, d_model)


def feed_forward_network(x, w1, b1, w2, b2, *, tm=512, t_ff=1024,
                         compute_dtype=jnp.bfloat16, out_dtype=None,
                         stream_weights=None, vmem_limit_bytes=None):
    """Convenience wrapper: prepares params then applies the fused FFN.

    For repeated calls (training / decoding), call prepare_ffn_params once and
    use ffn_apply directly so the weight pad/cast is not re-done per step.
    """
    params = prepare_ffn_params(w1, b1, w2, b2, t_ff=t_ff,
                                compute_dtype=compute_dtype)
    return ffn_apply(x, params, tm=tm, out_dtype=out_dtype,
                     stream_weights=stream_weights,
                     vmem_limit_bytes=vmem_limit_bytes)


if __name__ == "__main__":
    # Small shapes consistent with the module: batch=2, seq=8, d_model=32, d_ff=64
    batch, seq, d_model, d_ff = 2, 8, 32, 64

    key = jax.random.PRNGKey(0)
    kx, kw1, kb1, kw2, kb2 = jax.random.split(key, 5)

    x = jax.random.normal(kx, (batch, seq, d_model), dtype=jnp.float32)

    # Deterministic parameter init (mimics nn.Linear's uniform(-1/sqrt(in), 1/sqrt(in))).
    lim1 = 1.0 / jnp.sqrt(jnp.float32(d_model))
    lim2 = 1.0 / jnp.sqrt(jnp.float32(d_ff))
    w1 = jax.random.uniform(kw1, (d_model, d_ff), jnp.float32, -lim1, lim1)
    b1 = jax.random.uniform(kb1, (d_ff,), jnp.float32, -lim1, lim1)
    w2 = jax.random.uniform(kw2, (d_ff, d_model), jnp.float32, -lim2, lim2)
    b2 = jax.random.uniform(kb2, (d_model,), jnp.float32, -lim2, lim2)

    # Weights padded / cast / chunked ONCE (hoisted out of the hot path).
    params = prepare_ffn_params(w1, b1, w2, b2)

    out_resident = jax.block_until_ready(ffn_apply(x, params, stream_weights=False))
    out_streamed = jax.block_until_ready(ffn_apply(x, params, stream_weights=True))
    out_auto = jax.block_until_ready(feed_forward_network(x, w1, b1, w2, b2))

    assert out_resident.shape == (batch, seq, d_model)
    assert out_streamed.shape == (batch, seq, d_model)
    assert out_auto.shape == (batch, seq, d_model)

    # Reference 1: emulate the kernel's bf16-operand / f32-accumulate arithmetic.
    xb = x.astype(jnp.bfloat16).reshape(-1, d_model)
    w1b, w2b = w1.astype(jnp.bfloat16), w2.astype(jnp.bfloat16)
    h_ref = jnp.maximum(jnp.dot(xb, w1b, preferred_element_type=jnp.float32) + b1, 0.0)
    ref_bf16 = (jnp.dot(h_ref.astype(jnp.bfloat16), w2b,
                        preferred_element_type=jnp.float32) + b2)
    ref_bf16 = ref_bf16.reshape(batch, seq, d_model).astype(x.dtype)

    # Reference 2: full-f32 math (the PyTorch module's semantics).
    ref_f32 = jnp.maximum(x @ w1 + b1, 0.0) @ w2 + b2

    for out in (out_resident, out_streamed, out_auto):
        assert jnp.allclose(out, ref_bf16, atol=2e-3, rtol=2e-3)
        assert jnp.allclose(out, ref_f32, atol=5e-2, rtol=5e-2)
    assert jnp.allclose(out_resident, out_streamed, atol=1e-5, rtol=1e-5)

    print("KERNEL_OK")
</pallas_src>

<mosaic_0001>
module attributes {stable_mosaic.version = 11 : i64} {
  func.func @_ffn_resident_kernel(%arg0: i32, %arg1: memref<16x128xbf16, #tpu.memory_space<vmem>>, %arg2: memref<1x128x128xbf16, #tpu.memory_space<vmem>>, %arg3: memref<1x1x128xf32, #tpu.memory_space<vmem>>, %arg4: memref<1x128x128xbf16, #tpu.memory_space<vmem>>, %arg5: memref<1x128xf32, #tpu.memory_space<vmem>>, %arg6: memref<16x128xf32, #tpu.memory_space<vmem>>, %arg7: memref<16x128xf32, #tpu.memory_space<vmem>>) attributes {dimension_semantics = [#tpu.dimension_semantics<parallel>], iteration_bounds = array<i64: 1>, scalar_prefetch = 0 : i64, scratch_operands = 1 : i64, tpu.core_type = #tpu.core_type<tc>, window_params = [{transform_indices = @transform_0, window_bounds = array<i64: 16, 128>}, {pipeline_mode = #tpu.pipeline_mode<synchronous>, transform_indices = @transform_1, window_bounds = array<i64: 1, 128, 128>}, {pipeline_mode = #tpu.pipeline_mode<synchronous>, transform_indices = @transform_2, window_bounds = array<i64: 1, 1, 128>}, {pipeline_mode = #tpu.pipeline_mode<synchronous>, transform_indices = @transform_3, window_bounds = array<i64: 1, 128, 128>}, {pipeline_mode = #tpu.pipeline_mode<synchronous>, transform_indices = @transform_4, window_bounds = array<i64: 1, 128>}, {transform_indices = @transform_5, window_bounds = array<i64: 16, 128>}]} {
    %c0 = arith.constant 0 : index
    %c0_0 = arith.constant 0 : index
    %0 = vector.load %arg5[%c0, %c0_0] : memref<1x128xf32, #tpu.memory_space<vmem>>, vector<1x128xf32>
    %1 = vector.shape_cast %0 : vector<1x128xf32> to vector<1x128xf32>
    %2 = vector.broadcast %1 : vector<1x128xf32> to vector<16x128xf32>
    %c0_1 = arith.constant 0 : index
    %c0_2 = arith.constant 0 : index
    %3 = vector.load %arg7[%c0_1, %c0_2] : memref<16x128xf32, #tpu.memory_space<vmem>>, vector<16x128xf32>
    tpu.vector_store %arg7[%c0_1, %c0_2], %2 {strides = array<i32>} : memref<16x128xf32, #tpu.memory_space<vmem>>, vector<16x128xf32>,
    %c0_3 = arith.constant 0 : index
    %c0_4 = arith.constant 0 : index
    %4 = vector.load %arg1[%c0_3, %c0_4] : memref<16x128xbf16, #tpu.memory_space<vmem>>, vector<16x128xbf16>
    %c0_i32 = arith.constant 0 : i32
    %5 = arith.index_cast %c0_i32 : i32 to index
    %c0_5 = arith.constant 0 : index
    %c0_6 = arith.constant 0 : index
    %6 = vector.load %arg2[%5, %c0_5, %c0_6] : memref<1x128x128xbf16, #tpu.memory_space<vmem>>, vector<1x128x128xbf16>
    %7 = vector.shape_cast %6 : vector<1x128x128xbf16> to vector<128x128xbf16>
    %cst = arith.constant dense<0.000000e+00> : vector<16x128xf32>
    %8 = tpu.matmul %4, %7, %cst {dimension_numbers = #tpu.dot_dimension_numbers<[1], [0], [0], [1], [0, 0, 1, 1], [], []>} : vector<16x128xbf16>, vector<128x128xbf16>, vector<16x128xf32> -> vector<16x128xf32>
    %9 = arith.index_cast %c0_i32 : i32 to index
    %c0_7 = arith.constant 0 : index
    %c0_8 = arith.constant 0 : index
    %10 = vector.load %arg3[%9, %c0_7, %c0_8] : memref<1x1x128xf32, #tpu.memory_space<vmem>>, vector<1x1x128xf32>
    %11 = vector.shape_cast %10 : vector<1x1x128xf32> to vector<1x128xf32>
    %12 = vector.broadcast %11 : vector<1x128xf32> to vector<16x128xf32>
    %13 = arith.addf %8, %12 : vector<16x128xf32>
    %cst_9 = arith.constant 0.000000e+00 : f32
    %14 = vector.broadcast %cst_9 : f32 to vector<16x128xf32>
    %15 = arith.maximumf %13, %14 : vector<16x128xf32>
    %c0_10 = arith.constant 0 : index
    %c0_11 = arith.constant 0 : index
    %16 = vector.load %arg7[%c0_10, %c0_11] : memref<16x128xf32, #tpu.memory_space<vmem>>, vector<16x128xf32>
    %17 = arith.truncf %15 : vector<16x128xf32> to vector<16x128xbf16>
    %18 = arith.index_cast %c0_i32 : i32 to index
    %c0_12 = arith.constant 0 : index
    %c0_13 = arith.constant 0 : index
    %19 = vector.load %arg4[%18, %c0_12, %c0_13] : memref<1x128x128xbf16, #tpu.memory_space<vmem>>, vector<1x128x128xbf16>
    %20 = vector.shape_cast %19 : vector<1x128x128xbf16> to vector<128x128xbf16>
    %cst_14 = arith.constant dense<0.000000e+00> : vector<16x128xf32>
    %21 = tpu.matmul %17, %20, %cst_14 {dimension_numbers = #tpu.dot_dimension_numbers<[1], [0], [0], [1], [0, 0, 1, 1], [], []>} : vector<16x128xbf16>, vector<128x128xbf16>, vector<16x128xf32> -> vector<16x128xf32>
    %22 = arith.addf %16, %21 : vector<16x128xf32>
    %c0_15 = arith.constant 0 : index
    %c0_16 = arith.constant 0 : index
    %23 = vector.load %arg7[%c0_15, %c0_16] : memref<16x128xf32, #tpu.memory_space<vmem>>, vector<16x128xf32>
    tpu.vector_store %arg7[%c0_15, %c0_16], %22 {strides = array<i32>} : memref<16x128xf32, #tpu.memory_space<vmem>>, vector<16x128xf32>,
    %c1_i32 = arith.constant 1 : i32
    %c0_17 = arith.constant 0 : index
    %c0_18 = arith.constant 0 : index
    %24 = vector.load %arg7[%c0_17, %c0_18] : memref<16x128xf32, #tpu.memory_space<vmem>>, vector<16x128xf32>
    %c0_19 = arith.constant 0 : index
    %c0_20 = arith.constant 0 : index
    %25 = vector.load %arg6[%c0_19, %c0_20] : memref<16x128xf32, #tpu.memory_space<vmem>>, vector<16x128xf32>
    tpu.vector_store %arg6[%c0_19, %c0_20], %24 {strides = array<i32>} : memref<16x128xf32, #tpu.memory_space<vmem>>, vector<16x128xf32>,
    return
  }
  func.func @transform_0(%arg0: i32) -> (i32, i32) {
    %c0_i32 = arith.constant 0 : i32
    %c0_i32_0 = arith.constant 0 : i32
    return %arg0, %c0_i32 : i32, i32
  }
  func.func @transform_1(%arg0: i32) -> (i32, i32, i32) {
    %c0_i32 = arith.constant 0 : i32
    %c0_i32_0 = arith.constant 0 : i32
    %c0_i32_1 = arith.constant 0 : i32
    %c0_i32_2 = arith.constant 0 : i32
    return %c0_i32, %c0_i32_0, %c0_i32_1 : i32, i32, i32
  }
  func.func @transform_2(%arg0: i32) -> (i32, i32, i32) {
    %c0_i32 = arith.constant 0 : i32
    %c0_i32_0 = arith.constant 0 : i32
    %c0_i32_1 = arith.constant 0 : i32
    %c0_i32_2 = arith.constant 0 : i32
    return %c0_i32, %c0_i32_0, %c0_i32_1 : i32, i32, i32
  }
  func.func @transform_3(%arg0: i32) -> (i32, i32, i32) {
    %c0_i32 = arith.constant 0 : i32
    %c0_i32_0 = arith.constant 0 : i32
    %c0_i32_1 = arith.constant 0 : i32
    %c0_i32_2 = arith.constant 0 : i32
    return %c0_i32, %c0_i32_0, %c0_i32_1 : i32, i32, i32
  }
  func.func @transform_4(%arg0: i32) -> (i32, i32) {
    %c0_i32 = arith.constant 0 : i32
    %c0_i32_0 = arith.constant 0 : i32
    %c0_i32_1 = arith.constant 0 : i32
    return %c0_i32, %c0_i32_0 : i32, i32
  }
  func.func @transform_5(%arg0: i32) -> (i32, i32) {
    %c0_i32 = arith.constant 0 : i32
    %c0_i32_0 = arith.constant 0 : i32
    return %arg0, %c0_i32 : i32, i32
  }
}

module attributes {stable_mosaic.version = 11 : i64} {
  func.func @_ffn_resident_kernel(%arg0: i32, %arg1: memref<16x128xbf16, #tpu.memory_space<vmem>>, %arg2: memref<1x128x128xbf16, #tpu.memory_space<vmem>>, %arg3: memref<1x1x128xf32, #tpu.memory_space<vmem>>, %arg4: memref<1x128x128xbf16, #tpu.memory_space<vmem>>, %arg5: memref<1x128xf32, #tpu.memory_space<vmem>>, %arg6: memref<16x128xf32, #tpu.memory_space<vmem>>, %arg7: memref<16x128xf32, #tpu.memory_space<vmem>>) attributes {dimension_semantics = [#tpu.dimension_semantics<parallel>], iteration_bounds = array<i64: 1>, scalar_prefetch = 0 : i64, scratch_operands = 1 : i64, tpu.core_type = #tpu.core_type<tc>, window_params = [{transform_indices = @transform_0, window_bounds = array<i64: 16, 128>}, {pipeline_mode = #tpu.pipeline_mode<synchronous>, transform_indices = @transform_1, window_bounds = array<i64: 1, 128, 128>}, {pipeline_mode = #tpu.pipeline_mode<synchronous>, transform_indices = @transform_2, window_bounds = array<i64: 1, 1, 128>}, {pipeline_mode = #tpu.pipeline_mode<synchronous>, transform_indices = @transform_3, window_bounds = array<i64: 1, 128, 128>}, {pipeline_mode = #tpu.pipeline_mode<synchronous>, transform_indices = @transform_4, window_bounds = array<i64: 1, 128>}, {transform_indices = @transform_5, window_bounds = array<i64: 16, 128>}]} {
    %c0 = arith.constant 0 : index
    %c0_0 = arith.constant 0 : index
    %0 = vector.load %arg5[%c0, %c0_0] : memref<1x128xf32, #tpu.memory_space<vmem>>, vector<1x128xf32>
    %1 = vector.shape_cast %0 : vector<1x128xf32> to vector<1x128xf32>
    %2 = vector.broadcast %1 : vector<1x128xf32> to vector<16x128xf32>
    %c0_1 = arith.constant 0 : index
    %c0_2 = arith.constant 0 : index
    %3 = vector.load %arg7[%c0_1, %c0_2] : memref<16x128xf32, #tpu.memory_space<vmem>>, vector<16x128xf32>
    tpu.vector_store %arg7[%c0_1, %c0_2], %2 {strides = array<i32>} : memref<16x128xf32, #tpu.memory_space<vmem>>, vector<16x128xf32>,
    %c0_3 = arith.constant 0 : index
    %c0_4 = arith.constant 0 : index
    %4 = vector.load %arg1[%c0_3, %c0_4] : memref<16x128xbf16, #tpu.memory_space<vmem>>, vector<16x128xbf16>
    %c0_i32 = arith.constant 0 : i32
    %5 = arith.index_cast %c0_i32 : i32 to index
    %c0_5 = arith.constant 0 : index
    %c0_6 = arith.constant 0 : index
    %6 = vector.load %arg2[%5, %c0_5, %c0_6] : memref<1x128x128xbf16, #tpu.memory_space<vmem>>, vector<1x128x128xbf16>
    %7 = vector.shape_cast %6 : vector<1x128x128xbf16> to vector<128x128xbf16>
    %cst = arith.constant dense<0.000000e+00> : vector<16x128xf32>
    %8 = tpu.matmul %4, %7, %cst {dimension_numbers = #tpu.dot_dimension_numbers<[1], [0], [0], [1], [0, 0, 1, 1], [], []>} : vector<16x128xbf16>, vector<128x128xbf16>, vector<16x128xf32> -> vector<16x128xf32>
    %9 = arith.index_cast %c0_i32 : i32 to index
    %c0_7 = arith.constant 0 : index
    %c0_8 = arith.constant 0 : index
    %10 = vector.load %arg3[%9, %c0_7, %c0_8] : memref<1x1x128xf32, #tpu.memory_space<vmem>>, vector<1x1x128xf32>
    %11 = vector.shape_cast %10 : vector<1x1x128xf32> to vector<1x128xf32>
    %12 = vector.broadcast %11 : vector<1x128xf32> to vector<16x128xf32>
    %13 = arith.addf %8, %12 : vector<16x128xf32>
    %cst_9 = arith.constant 0.000000e+00 : f32
    %14 = vector.broadcast %cst_9 : f32 to vector<16x128xf32>
    %15 = arith.maximumf %13, %14 : vector<16x128xf32>
    %c0_10 = arith.constant 0 : index
    %c0_11 = arith.constant 0 : index
    %16 = vector.load %arg7[%c0_10, %c0_11] : memref<16x128xf32, #tpu.memory_space<vmem>>, vector<16x128xf32>
    %17 = arith.truncf %15 : vector<16x128xf32> to vector<16x128xbf16>
    %18 = arith.index_cast %c0_i32 : i32 to index
    %c0_12 = arith.constant 0 : index
    %c0_13 = arith.constant 0 : index
    %19 = vector.load %arg4[%18, %c0_12, %c0_13] : memref<1x128x128xbf16, #tpu.memory_space<vmem>>, vector<1x128x128xbf16>
    %20 = vector.shape_cast %19 : vector<1x128x128xbf16> to vector<128x128xbf16>
    %cst_14 = arith.constant dense<0.000000e+00> : vector<16x128xf32>
    %21 = tpu.matmul %17, %20, %cst_14 {dimension_numbers = #tpu.dot_dimension_numbers<[1], [0], [0], [1], [0, 0, 1, 1], [], []>} : vector<16x128xbf16>, vector<128x128xbf16>, vector<16x128xf32> -> vector<16x128xf32>
    %22 = arith.addf %16, %21 : vector<16x128xf32>
    %c0_15 = arith.constant 0 : index
    %c0_16 = arith.constant 0 : index
    %23 = vector.load %arg7[%c0_15, %c0_16] : memref<16x128xf32, #tpu.memory_space<vmem>>, vector<16x128xf32>
    tpu.vector_store %arg7[%c0_15, %c0_16], %22 {strides = array<i32>} : memref<16x128xf32, #tpu.memory_space<vmem>>, vector<16x128xf32>,
    %c1_i32 = arith.constant 1 : i32
    %c0_17 = arith.constant 0 : index
    %c0_18 = arith.constant 0 : index
    %24 = vector.load %arg7[%c0_17, %c0_18] : memref<16x128xf32, #tpu.memory_space<vmem>>, vector<16x128xf32>
    %c0_19 = arith.constant 0 : index
    %c0_20 = arith.constant 0 : index
    %25 = vector.load %arg6[%c0_19, %c0_20] : memref<16x128xf32, #tpu.memory_space<vmem>>, vector<16x128xf32>
    tpu.vector_store %arg6[%c0_19, %c0_20], %24 {strides = array<i32>} : memref<16x128xf32, #tpu.memory_space<vmem>>, vector<16x128xf32>,
    return
  }
  func.func @transform_0(%arg0: i32) -> (i32, i32) {
    %c0_i32 = arith.constant 0 : i32
    %c0_i32_0 = arith.constant 0 : i32
    return %arg0, %c0_i32 : i32, i32
  }
  func.func @transform_1(%arg0: i32) -> (i32, i32, i32) {
    %c0_i32 = arith.constant 0 : i32
    %c0_i32_0 = arith.constant 0 : i32
    %c0_i32_1 = arith.constant 0 : i32
    %c0_i32_2 = arith.constant 0 : i32
    return %c0_i32, %c0_i32_0, %c0_i32_1 : i32, i32, i32
  }
  func.func @transform_2(%arg0: i32) -> (i32, i32, i32) {
    %c0_i32 = arith.constant 0 : i32
    %c0_i32_0 = arith.constant 0 : i32
    %c0_i32_1 = arith.constant 0 : i32
    %c0_i32_2 = arith.constant 0 : i32
    return %c0_i32, %c0_i32_0, %c0_i32_1 : i32, i32, i32
  }
  func.func @transform_3(%arg0: i32) -> (i32, i32, i32) {
    %c0_i32 = arith.constant 0 : i32
    %c0_i32_0 = arith.constant 0 : i32
    %c0_i32_1 = arith.constant 0 : i32
    %c0_i32_2 = arith.constant 0 : i32
    return %c0_i32, %c0_i32_0, %c0_i32_1 : i32, i32, i32
  }
  func.func @transform_4(%arg0: i32) -> (i32, i32) {
    %c0_i32 = arith.constant 0 : i32
    %c0_i32_0 = arith.constant 0 : i32
    %c0_i32_1 = arith.constant 0 : i32
    return %c0_i32, %c0_i32_0 : i32, i32
  }
  func.func @transform_5(%arg0: i32) -> (i32, i32) {
    %c0_i32 = arith.constant 0 : i32
    %c0_i32_0 = arith.constant 0 : i32
    return %arg0, %c0_i32 : i32, i32
  }
}

</mosaic_0001>

<bundles_post_ra>
// kernel: tpu_custom_call.1
= control target key start
LH: loop header
LB: loop body
LE: loop exit
PB: predicated region body
PF: predicated region fallthrough
CT: control target
= control target key end

     0   :  { %10 = vsyncpa [#allocation4], 0  ;;  %s576_s0 = inlined_call_operand.hbm [shape: bf16[16,128], index: 0, kind: input, shape index: {}]   ;;  %s577_s1 = inlined_call_operand.hbm [shape: bf16[1,128,128], index: 1, kind: input, shape index: {}]   ;;  %s578_s2 = inlined_call_operand.vmem [shape: f32[1,1,128], index: 2, kind: input, shape index: {}]   ;;  %s579_s3 = inlined_call_operand.hbm [shape: bf16[1,128,128], index: 3, kind: input, shape index: {}]   ;;  %s580_s4 = inlined_call_operand.vmem [shape: f32[1,128], index: 4, kind: input, shape index: {}]   ;;  %s581_s5 = inlined_call_operand.hbm [shape: f32[16,128], index: 5, kind: output, shape index: {}]  }
   0x1   :  { %11 = vsyncpa [#allocation7], 0 }
   0x2   :  { %12 = vsyncpa [#allocation5], 0  ;;  %s518_s18 = smov [#allocation6]   ;;  %s519_s20 = smov [#allocation3]  }
   0x3   :  { %s30_s19 = sshll.u32 %s518_s18, 4  ;;  %s18_s21 = sshll.u32 %s519_s20, 4  ;;  %s31_s19 = int_to_ptr.vmem [resolvable:$true] %s30_s19  ;;  %s19_s21 = int_to_ptr.vmem [resolvable:$true] %s18_s21 }
   0x4   :  { %s440_s22 = scalar_lea.vmem %s31_s19, 1024  ;;  %p445_p1 = scmp.lt.s32.totalorder %s31_s19, %s31_s19 }
   0x5   :  { %p441_p0 = scmp.ne.s32.totalorder %s31_s19, %s440_s22  ;;  %p446_p2 = scmp.lt.s32.totalorder %s440_s22, %s440_s22 }
   0x7   :  { %p447_p3 = por %p446_p2, %p445_p1 }
   0x9   :  { %p448_p4 = pnand %p447_p3, %p441_p0 }
   0xb   :  { %451 = shalt.err (!%p448_p4)
}
   0xc   :  { %s520_s23 = smov 64   ;;  %s521_s24 = smov 4  }
   0xd   :  { %36 = dma.hbm_to_vmem [thread:$0]  %s577_s1, 1024, %s31_s19, [#allocation7], %s520_s23, %s520_s23, %s521_s24  }
   0xe   :  { %s460_s27 = scalar_lea.vmem %s19_s21, 128  ;;  %p465_p6 = scmp.lt.s32.totalorder %s19_s21, %s19_s21 }
   0xf   :  { %p461_p5 = scmp.ne.s32.totalorder %s19_s21, %s460_s27  ;;  %p466_p7 = scmp.lt.s32.totalorder %s460_s27, %s460_s27 }
  0x11   :  { %p467_p8 = por %p466_p7, %p465_p6 }
  0x13   :  { %p468_p9 = pnand %p467_p8, %p461_p5 }
  0x15   :  { %471 = shalt.err (!%p468_p9)
}
  0x16   :  { %24 = dma.hbm_to_vmem [thread:$0]  %s576_s0, 128, %s19_s21, [#allocation4], %s520_s23, %s520_s23, %s521_s24  }
  0x17   :  { %s522_s30 = smov [#allocation8]  }
  0x18   :  { %s44_s6 = sshll.u32 %s522_s30, 4  ;;  %s45_s6 = int_to_ptr.vmem [resolvable:$true] %s44_s6 }
  0x19   :  { %s480_s7 = scalar_lea.vmem %s45_s6, 1024  ;;  %p485_p11 = scmp.lt.s32.totalorder %s45_s6, %s45_s6 }
  0x1a   :  { %p481_p10 = scmp.ne.s32.totalorder %s45_s6, %s480_s7  ;;  %p486_p12 = scmp.lt.s32.totalorder %s480_s7, %s480_s7 }
  0x1c   :  { %p487_p13 = por %p486_p12, %p485_p11 }
  0x1e   :  { %p488_p0 = pnand %p487_p13, %p481_p10 }
  0x20   :  { %491 = shalt.err (!%p488_p0)
}
  0x21   :  { %50 = dma.hbm_to_vmem [thread:$0]  %s579_s3, 1024, %s45_s6, [#allocation7], %s520_s23, %s520_s23, %s521_s24  }
  0x22   :  { %512 = dma.done.wait [#allocation4], 128  }
  0x23   :  { %513 = vsyncadd [#allocation4], 4294967168 }
  0x24   :  { %514 = dma.done.wait [#allocation7], 2048  }
  0x25   :  { %515 = vsyncadd [#allocation7], 4294965248  ;;  %v523_v0 = vmov 0.0   ;;  %vm524_vm0 = vmmov 0   ;;  %v415_v1 = vld [vmem:[#allocation6 + $0x38] sm:$0xff]   ;;  %v416_v2 = vld [vmem:[#allocation6 + $0x30] sm:$0xff]  }
  0x26   :  { %365 = vmatprep.subr.bf16.mxu0 %v523_v0  ;;  %381 = vmatprep.mubr.msk.bf16.mxu0 %vm524_vm0, %v523_v0  ;;  %v417_v3 = vld [vmem:[#allocation6 + $0x28] sm:$0xff]   ;;  %v424_v4 = vld [vmem:[#allocation8 + $0x38] sm:$0xff]   ;;  %v418_v5 = vld [vmem:[#allocation6 + $0x20] sm:$0xff]   ;;  %s525_s11 = smov [#allocation9]  }
  0x27   :  { %385 = vmatprep.subr.bf16.mxu1 %v523_v0  ;;  %401 = vmatprep.mubr.msk.bf16.mxu1 %vm524_vm0, %v523_v0  ;;  %v425_v6 = vld [vmem:[#allocation8 + $0x30] sm:$0xff]   ;;  %v419_v7 = vld [vmem:[#allocation6 + $0x18] sm:$0xff]   ;;  %v426_v8 = vld [vmem:[#allocation8 + $0x28] sm:$0xff]   ;;  %s315_s12 = sshll.u32 %s525_s11, 4  ;;  %s316_s12 = int_to_ptr.vmem [resolvable:$true] %s315_s12 }
  0x28   :  { %366 = vmatpush3.bf16.msra.mxu0 %v415_v1  ;;  %386 = vmatpush3.bf16.msra.mxu1 %v424_v4  ;;  %v420_v9 = vld [vmem:[#allocation6 + $0x10] sm:$0xff]   ;;  %v427_v10 = vld [vmem:[#allocation8 + $0x20] sm:$0xff]   ;;  %v421_v11 = vld [vmem:[#allocation6 + $0x8] sm:$0xff]   ;;  %p497_p2 = scmp.lt.s32.totalorder %s316_s12, %s316_s12 }
  0x29   :  { %367 = vmatprep.subr.bf16.mxu0 %v523_v0  ;;  %387 = vmatprep.subr.bf16.mxu1 %v523_v0  ;;  %v428_v12 = vld [vmem:[#allocation8 + $0x18] sm:$0xff]   ;;  %v422_v13 = vld [vmem:[#allocation6] sm:$0xff]   ;;  %v429_v15 = vld [vmem:[#allocation8 + $0x10] sm:$0xff]  }
  0x2a   :  { %v423_v14 = vld [vmem:[#allocation3] sm:$0xff]   ;;  %v430_v16 = vld [vmem:[#allocation8 + $0x8] sm:$0xff]   ;;  %v431_v17 = vld [vmem:[#allocation8] sm:$0xff]  }
  0x2b   :  { %v329_v18 = vld [vmem:[%s578_s2] ss:$0 sm:$0xff]  ;;  %s492_s2 = scalar_lea.vmem %s316_s12, 256 }
  0x2c   :  { %368 = vmatpush3.bf16.msra.mxu0 %v416_v2  ;;  %388 = vmatpush3.bf16.msra.mxu1 %v425_v6  ;;  %v328_v28 = vld [vmem:[%s580_s4] ss:$0 sm:$0xff]  ;;  %p493_p1 = scmp.ne.s32.totalorder %s316_s12, %s492_s2  ;;  %p498_p3 = scmp.lt.s32.totalorder %s492_s2, %s492_s2 }
  0x2d   :  { %369 = vmatprep.subr.bf16.mxu0 %v523_v0  ;;  %389 = vmatprep.subr.bf16.mxu1 %v523_v0 }
  0x2e   :  { %p499_p4 = por %p498_p3, %p497_p2 }
  0x30   :  { %370 = vmatpush3.bf16.msra.mxu0 %v417_v3  ;;  %390 = vmatpush3.bf16.msra.mxu1 %v426_v8  ;;  %p500_p5 = pnand %p499_p4, %p493_p1 }
  0x31   :  { %371 = vmatprep.subr.bf16.mxu0 %v523_v0  ;;  %391 = vmatprep.subr.bf16.mxu1 %v523_v0 }
  0x34   :  { %372 = vmatpush3.bf16.msra.mxu0 %v418_v5  ;;  %392 = vmatpush3.bf16.msra.mxu1 %v427_v10 }
  0x35   :  { %373 = vmatprep.subr.bf16.mxu0 %v523_v0  ;;  %393 = vmatprep.subr.bf16.mxu1 %v523_v0 }
  0x38   :  { %374 = vmatpush3.bf16.msra.mxu0 %v419_v7  ;;  %394 = vmatpush3.bf16.msra.mxu1 %v428_v12 }
  0x39   :  { %375 = vmatprep.subr.bf16.mxu0 %v523_v0  ;;  %395 = vmatprep.subr.bf16.mxu1 %v523_v0 }
  0x3c   :  { %376 = vmatpush3.bf16.msra.mxu0 %v420_v9  ;;  %396 = vmatpush3.bf16.msra.mxu1 %v429_v15 }
  0x3d   :  { %377 = vmatprep.subr.bf16.mxu0 %v523_v0  ;;  %397 = vmatprep.subr.bf16.mxu1 %v523_v0 }
  0x40   :  { %378 = vmatpush3.bf16.msra.mxu0 %v421_v11  ;;  %398 = vmatpush3.bf16.msra.mxu1 %v430_v16 }
  0x41   :  { %379 = vmatprep.subr.bf16.mxu0 %v523_v0  ;;  %399 = vmatprep.subr.bf16.mxu1 %v523_v0 }
  0x44   :  { %380 = vmatpush3.bf16.msra.mxu0 %v422_v13  ;;  %400 = vmatpush3.bf16.msra.mxu1 %v431_v17 }
  0x47   :  { %382 = vmatmul.mubr.bf16.vlgmr.msra.gmra.mxu0 %v423_v14 }
 0x107   :  { %v185_v19 = vpop.f32.mrf.mxu0 }
 0x108   :  { %v186_v21 = vadd.f32 %v329_v18, %v185_v19 }
 0x109   :  { %v383_v20 = vpop.f32.mrf.mxu0 }
 0x10a   :  { %v192_v25 = vmax.f32 %v186_v21, 0.0 }
 0x10b   :  { %v188_v22 = vpop.f32.mrf.mxu0 }
 0x10c   :  { %v189_v23 = vadd.f32 %v329_v18, %v188_v22 }
 0x10d   :  { %v384_v24 = vpop.f32.mrf.mxu0 }
 0x10e   :  { %v193_v26 = vmax.f32 %v189_v23, 0.0 }
 0x110   :  { %v196_v27 = vpack.c.bf16 %v193_v26, %v192_v25 }
 0x112   :  { %402 = vmatmul.mubr.bf16.vlgmr.msra.gmra.mxu1 %v196_v27 }
 0x1d2   :  { %v295_v29 = vpop.f32.mrf.mxu1 }
 0x1d3   :  { %v302_v30 = vadd.f32 %v328_v28, %v295_v29 }
 0x1d4   :  { %v403_v31 = vpop.f32.mrf.mxu1 }
 0x1d5   :  { %308 = vst [vmem:[#allocation9] sm:$0xff] %v302_v30 }
 0x1d6   :  { %v298_v32 = vpop.f32.mrf.mxu1 }
 0x1d7   :  { %v303_v33 = vadd.f32 %v328_v28, %v298_v32 }
 0x1d8   :  { %v404_v34 = vpop.f32.mrf.mxu1 }
 0x1d9   :  { %309 = vst [vmem:[#allocation9 + $0x8] sm:$0xff] %v303_v33 }
 0x1da   :  { %503 = shalt.err (!%p500_p5)
}
 0x1db   :  { %s526_s13 = smov 128   ;;  %s527_s4 = smov 8  }
 0x1dc   :  { %321 = dma.vmem_to_hbm [thread:$0]  %s316_s12, 256, %s581_s5, [#allocation5], %s526_s13, %s526_s13, %s527_s4  }
 0x1dd   :  { %516 = dma.done.wait [#allocation5], 256  }
 0x1de   :  { %517 = vsyncadd [#allocation5], 4294967040 }
 0x1df   :  { %325 = vsyncpa [#allocation4], 1 }
 0x1e0   :  { %326 = vsyncpa [#allocation7], 1 }
 0x1e1   :  { %327 = vsyncpa [#allocation5], 1 }

// kernel: tpu_custom_call.1
= control target key start
LH: loop header
LB: loop body
LE: loop exit
PB: predicated region body
PF: predicated region fallthrough
CT: control target
= control target key end

     0   :  { %10 = vsyncpa [#allocation4], 0  ;;  %s576_s0 = inlined_call_operand.hbm [shape: bf16[16,128], index: 0, kind: input, shape index: {}]   ;;  %s577_s1 = inlined_call_operand.hbm [shape: bf16[1,128,128], index: 1, kind: input, shape index: {}]   ;;  %s578_s2 = inlined_call_operand.vmem [shape: f32[1,1,128], index: 2, kind: input, shape index: {}]   ;;  %s579_s3 = inlined_call_operand.hbm [shape: bf16[1,128,128], index: 3, kind: input, shape index: {}]   ;;  %s580_s4 = inlined_call_operand.vmem [shape: f32[1,128], index: 4, kind: input, shape index: {}]   ;;  %s581_s5 = inlined_call_operand.hbm [shape: f32[16,128], index: 5, kind: output, shape index: {}]  }
   0x1   :  { %11 = vsyncpa [#allocation7], 0 }
   0x2   :  { %12 = vsyncpa [#allocation5], 0  ;;  %s518_s18 = smov [#allocation6]   ;;  %s519_s20 = smov [#allocation3]  }
   0x3   :  { %s30_s19 = sshll.u32 %s518_s18, 4  ;;  %s18_s21 = sshll.u32 %s519_s20, 4  ;;  %s31_s19 = int_to_ptr.vmem [resolvable:$true] %s30_s19  ;;  %s19_s21 = int_to_ptr.vmem [resolvable:$true] %s18_s21 }
   0x4   :  { %s440_s22 = scalar_lea.vmem %s31_s19, 1024  ;;  %p445_p1 = scmp.lt.s32.totalorder %s31_s19, %s31_s19 }
   0x5   :  { %p441_p0 = scmp.ne.s32.totalorder %s31_s19, %s440_s22  ;;  %p446_p2 = scmp.lt.s32.totalorder %s440_s22, %s440_s22 }
   0x7   :  { %p447_p3 = por %p446_p2, %p445_p1 }
   0x9   :  { %p448_p4 = pnand %p447_p3, %p441_p0 }
   0xb   :  { %451 = shalt.err (!%p448_p4)
}
   0xc   :  { %s520_s23 = smov 64   ;;  %s521_s24 = smov 4  }
   0xd   :  { %36 = dma.hbm_to_vmem [thread:$0]  %s577_s1, 1024, %s31_s19, [#allocation7], %s520_s23, %s520_s23, %s521_s24  }
   0xe   :  { %s460_s27 = scalar_lea.vmem %s19_s21, 128  ;;  %p465_p6 = scmp.lt.s32.totalorder %s19_s21, %s19_s21 }
   0xf   :  { %p461_p5 = scmp.ne.s32.totalorder %s19_s21, %s460_s27  ;;  %p466_p7 = scmp.lt.s32.totalorder %s460_s27, %s460_s27 }
  0x11   :  { %p467_p8 = por %p466_p7, %p465_p6 }
  0x13   :  { %p468_p9 = pnand %p467_p8, %p461_p5 }
  0x15   :  { %471 = shalt.err (!%p468_p9)
}
  0x16   :  { %24 = dma.hbm_to_vmem [thread:$0]  %s576_s0, 128, %s19_s21, [#allocation4], %s520_s23, %s520_s23, %s521_s24  }
  0x17   :  { %s522_s30 = smov [#allocation8]  }
  0x18   :  { %s44_s6 = sshll.u32 %s522_s30, 4  ;;  %s45_s6 = int_to_ptr.vmem [resolvable:$true] %s44_s6 }
  0x19   :  { %s480_s7 = scalar_lea.vmem %s45_s6, 1024  ;;  %p485_p11 = scmp.lt.s32.totalorder %s45_s6, %s45_s6 }
  0x1a   :  { %p481_p10 = scmp.ne.s32.totalorder %s45_s6, %s480_s7  ;;  %p486_p12 = scmp.lt.s32.totalorder %s480_s7, %s480_s7 }
  0x1c   :  { %p487_p13 = por %p486_p12, %p485_p11 }
  0x1e   :  { %p488_p0 = pnand %p487_p13, %p481_p10 }
  0x20   :  { %491 = shalt.err (!%p488_p0)
}
  0x21   :  { %50 = dma.hbm_to_vmem [thread:$0]  %s579_s3, 1024, %s45_s6, [#allocation7], %s520_s23, %s520_s23, %s521_s24  }
  0x22   :  { %512 = dma.done.wait [#allocation4], 128  }
  0x23   :  { %513 = vsyncadd [#allocation4], 4294967168 }
  0x24   :  { %514 = dma.done.wait [#allocation7], 2048  }
  0x25   :  { %515 = vsyncadd [#allocation7], 4294965248  ;;  %v523_v0 = vmov 0.0   ;;  %vm524_vm0 = vmmov 0   ;;  %v415_v1 = vld [vmem:[#allocation6 + $0x38] sm:$0xff]   ;;  %v416_v2 = vld [vmem:[#allocation6 + $0x30] sm:$0xff]  }
  0x26   :  { %365 = vmatprep.subr.bf16.mxu0 %v523_v0  ;;  %381 = vmatprep.mubr.msk.bf16.mxu0 %vm524_vm0, %v523_v0  ;;  %v417_v3 = vld [vmem:[#allocation6 + $0x28] sm:$0xff]   ;;  %v424_v4 = vld [vmem:[#allocation8 + $0x38] sm:$0xff]   ;;  %v418_v5 = vld [vmem:[#allocation6 + $0x20] sm:$0xff]   ;;  %s525_s11 = smov [#allocation9]  }
  0x27   :  { %385 = vmatprep.subr.bf16.mxu1 %v523_v0  ;;  %401 = vmatprep.mubr.msk.bf16.mxu1 %vm524_vm0, %v523_v0  ;;  %v425_v6 = vld [vmem:[#allocation8 + $0x30] sm:$0xff]   ;;  %v419_v7 = vld [vmem:[#allocation6 + $0x18] sm:$0xff]   ;;  %v426_v8 = vld [vmem:[#allocation8 + $0x28] sm:$0xff]   ;;  %s315_s12 = sshll.u32 %s525_s11, 4  ;;  %s316_s12 = int_to_ptr.vmem [resolvable:$true] %s315_s12 }
  0x28   :  { %366 = vmatpush3.bf16.msra.mxu0 %v415_v1  ;;  %386 = vmatpush3.bf16.msra.mxu1 %v424_v4  ;;  %v420_v9 = vld [vmem:[#allocation6 + $0x10] sm:$0xff]   ;;  %v427_v10 = vld [vmem:[#allocation8 + $0x20] sm:$0xff]   ;;  %v421_v11 = vld [vmem:[#allocation6 + $0x8] sm:$0xff]   ;;  %p497_p2 = scmp.lt.s32.totalorder %s316_s12, %s316_s12 }
  0x29   :  { %367 = vmatprep.subr.bf16.mxu0 %v523_v0  ;;  %387 = vmatprep.subr.bf16.mxu1 %v523_v0  ;;  %v428_v12 = vld [vmem:[#allocation8 + $0x18] sm:$0xff]   ;;  %v422_v13 = vld [vmem:[#allocation6] sm:$0xff]   ;;  %v429_v15 = vld [vmem:[#allocation8 + $0x10] sm:$0xff]  }
  0x2a   :  { %v423_v14 = vld [vmem:[#allocation3] sm:$0xff]   ;;  %v430_v16 = vld [vmem:[#allocation8 + $0x8] sm:$0xff]   ;;  %v431_v17 = vld [vmem:[#allocation8] sm:$0xff]  }
  0x2b   :  { %v329_v18 = vld [vmem:[%s578_s2] ss:$0 sm:$0xff]  ;;  %s492_s2 = scalar_lea.vmem %s316_s12, 256 }
  0x2c   :  { %368 = vmatpush3.bf16.msra.mxu0 %v416_v2  ;;  %388 = vmatpush3.bf16.msra.mxu1 %v425_v6  ;;  %v328_v28 = vld [vmem:[%s580_s4] ss:$0 sm:$0xff]  ;;  %p493_p1 = scmp.ne.s32.totalorder %s316_s12, %s492_s2  ;;  %p498_p3 = scmp.lt.s32.totalorder %s492_s2, %s492_s2 }
  0x2d   :  { %369 = vmatprep.subr.bf16.mxu0 %v523_v0  ;;  %389 = vmatprep.subr.bf16.mxu1 %v523_v0 }
  0x2e   :  { %p499_p4 = por %p498_p3, %p497_p2 }
  0x30   :  { %370 = vmatpush3.bf16.msra.mxu0 %v417_v3  ;;  %390 = vmatpush3.bf16.msra.mxu1 %v426_v8  ;;  %p500_p5 = pnand %p499_p4, %p493_p1 }
  0x31   :  { %371 = vmatprep.subr.bf16.mxu0 %v523_v0  ;;  %391 = vmatprep.subr.bf16.mxu1 %v523_v0 }
  0x34   :  { %372 = vmatpush3.bf16.msra.mxu0 %v418_v5  ;;  %392 = vmatpush3.bf16.msra.mxu1 %v427_v10 }
  0x35   :  { %373 = vmatprep.subr.bf16.mxu0 %v523_v0  ;;  %393 = vmatprep.subr.bf16.mxu1 %v523_v0 }
  0x38   :  { %374 = vmatpush3.bf16.msra.mxu0 %v419_v7  ;;  %394 = vmatpush3.bf16.msra.mxu1 %v428_v12 }
  0x39   :  { %375 = vmatprep.subr.bf16.mxu0 %v523_v0  ;;  %395 = vmatprep.subr.bf16.mxu1 %v523_v0 }
  0x3c   :  { %376 = vmatpush3.bf16.msra.mxu0 %v420_v9  ;;  %396 = vmatpush3.bf16.msra.mxu1 %v429_v15 }
  0x3d   :  { %377 = vmatprep.subr.bf16.mxu0 %v523_v0  ;;  %397 = vmatprep.subr.bf16.mxu1 %v523_v0 }
  0x40   :  { %378 = vmatpush3.bf16.msra.mxu0 %v421_v11  ;;  %398 = vmatpush3.bf16.msra.mxu1 %v430_v16 }
  0x41   :  { %379 = vmatprep.subr.bf16.mxu0 %v523_v0  ;;  %399 = vmatprep.subr.bf16.mxu1 %v523_v0 }
  0x44   :  { %380 = vmatpush3.bf16.msra.mxu0 %v422_v13  ;;  %400 = vmatpush3.bf16.msra.mxu1 %v431_v17 }
  0x47   :  { %382 = vmatmul.mubr.bf16.vlgmr.msra.gmra.mxu0 %v423_v14 }
 0x107   :  { %v185_v19 = vpop.f32.mrf.mxu0 }
 0x108   :  { %v186_v21 = vadd.f32 %v329_v18, %v185_v19 }
 0x109   :  { %v383_v20 = vpop.f32.mrf.mxu0 }
 0x10a   :  { %v192_v25 = vmax.f32 %v186_v21, 0.0 }
 0x10b   :  { %v188_v22 = vpop.f32.mrf.mxu0 }
 0x10c   :  { %v189_v23 = vadd.f32 %v329_v18, %v188_v22 }
 0x10d   :  { %v384_v24 = vpop.f32.mrf.mxu0 }
 0x10e   :  { %v193_v26 = vmax.f32 %v189_v23, 0.0 }
 0x110   :  { %v196_v27 = vpack.c.bf16 %v193_v26, %v192_v25 }
 0x112   :  { %402 = vmatmul.mubr.bf16.vlgmr.msra.gmra.mxu1 %v196_v27 }
 0x1d2   :  { %v295_v29 = vpop.f32.mrf.mxu1 }
 0x1d3   :  { %v302_v30 = vadd.f32 %v328_v28, %v295_v29 }
 0x1d4   :  { %v403_v31 = vpop.f32.mrf.mxu1 }
 0x1d5   :  { %308 = vst [vmem:[#allocation9] sm:$0xff] %v302_v30 }
 0x1d6   :  { %v298_v32 = vpop.f32.mrf.mxu1 }
 0x1d7   :  { %v303_v33 = vadd.f32 %v328_v28, %v298_v32 }
 0x1d8   :  { %v404_v34 = vpop.f32.mrf.mxu1 }
 0x1d9   :  { %309 = vst [vmem:[#allocation9 + $0x8] sm:$0xff] %v303_v33 }
 0x1da   :  { %503 = shalt.err (!%p500_p5)
}
 0x1db   :  { %s526_s13 = smov 128   ;;  %s527_s4 = smov 8  }
 0x1dc   :  { %321 = dma.vmem_to_hbm [thread:$0]  %s316_s12, 256, %s581_s5, [#allocation5], %s526_s13, %s526_s13, %s527_s4  }
 0x1dd   :  { %516 = dma.done.wait [#allocation5], 256  }
 0x1de   :  { %517 = vsyncadd [#allocation5], 4294967040 }
 0x1df   :  { %325 = vsyncpa [#allocation4], 1 }
 0x1e0   :  { %326 = vsyncpa [#allocation7], 1 }
 0x1e1   :  { %327 = vsyncpa [#allocation5], 1 }

</bundles_post_ra>
